<compile_context>
chip_gen: v5e
topology: v5e:2x2
jax: 0.10.0
libtpu: 0.0.40
codegen_flags: <defaults>
</compile_context>

<pallas_src>
import jax
import jax.numpy as jnp
from jax.experimental import pallas as pl
from jax.experimental.pallas import tpu as pltpu

# Geometry implied by the module: after permute(0,2,3,1) the conv stack sees
# channels = original H (must equal 64) and spatial = (original W, original C);
# conv2's (48,1) kernel forces original W == 48.  Original C is free; we use 4.
N_BATCH = 2
C_IN = 4            # original channels -> conv "width"
H_IN = 64           # original height   -> conv "channels"
W_IN = 48           # original width    -> conv "height"
CH0, CH1, CH2 = 64, 32, 16   # channel widths through conv0 / conv1 / conv2 inputs
PAD = 8             # zero super-rows before the fold and after each folded batch
BP = 8              # padded batch rows for the conv2 finale / output block


def _pick_b_tile(n):
    """Batches folded per grid step: keep >=2 grid steps (v7x megacore) and grow the
    tile toward 8 for large batches to amortise per-step fixed overhead."""
    for bt in (8, 4, 2, 1):
        if n % bt == 0 and n // bt >= 2:
            return bt
    return 1


def _band_weights(wmat, ws, cin, cout):
    """(cout, cin, 3, 3) conv weights -> per-kh block-banded matrices
    (3, ws*cin, ws*cout) with A[kh, ws_*cin + ci, wo*cout + co] = wmat[co, ci, kh, ws_-wo+1]
    (zero outside the +/-1 band), bf16 for the MXU.  The band zeros implement the
    conv's width zero-padding, so no in-kernel masks are needed."""
    base = jnp.transpose(wmat, (2, 3, 1, 0))              # (kh, kw, cin, cout)
    zero = jnp.zeros((3, cin, cout), wmat.dtype)
    src_blocks = []
    for ws_ in range(ws):
        out_blocks = []
        for wo in range(ws):
            kw = ws_ - wo + 1
            out_blocks.append(base[:, kw] if 0 <= kw <= 2 else zero)
        src_blocks.append(jnp.stack(out_blocks, axis=2))  # (kh, cin, ws_out, cout)
    a = jnp.stack(src_blocks, axis=1)                     # (kh, ws_src, cin, ws_out, cout)
    return a.reshape(3, ws * cin, ws * cout).astype(jnp.bfloat16)


@jax.jit
def discriminator_forward(x, w0, w1, w2):
    n, ws, ch_in, hs = x.shape
    assert ch_in == CH0 and hs == W_IN, "module requires original H == 64 and W == 48"
    b_tile = _pick_b_tile(n)
    nt = n // b_tile
    seg = hs + PAD                      # super-rows per folded batch (interior + pad)
    canvas = PAD + b_tile * seg         # rows per tile slab (leading pad + segments)
    m_out = b_tile * seg - PAD          # rows for which conv outputs are computed
    lx, l0, l1 = ws * CH0, ws * CH1, ws * CH2   # lane widths: 256 / 128 / 64

    # ---- host-side layout & weight prep ----
    # super-row slab: row = (batch, conv-height h), lane = w*64 + cin
    xs = jnp.transpose(x, (0, 3, 1, 2)).reshape(n, hs, lx).astype(jnp.float32)
    xs = jnp.pad(xs, ((0, 0), (0, PAD), (0, 0)))                       # per-batch pad
    xs = jnp.pad(xs.reshape(nt, b_tile * seg, lx), ((0, 0), (PAD, 0), (0, 0)))
    x_all = xs.reshape(nt * canvas, lx)

    a0 = _band_weights(w0, ws, CH0, CH1)      # (3, 256, 128) bf16
    a1 = _band_weights(w1, ws, CH1, CH2)      # (3, 128,  64) bf16

    # conv2 per-row weights in the folded layout (zero on pad rows).
    w2_h = jnp.transpose(w2[0, :, :, 0], (1, 0))                       # (48, 16) [h, c]
    w2_rows = jnp.tile(jnp.pad(jnp.tile(w2_h, (1, ws)), ((0, PAD), (0, 0))),
                       (b_tile, 1))[:m_out].astype(jnp.float32)        # (m_out, 64)

    # batch-membership matrix (rows >= b_tile and pad rows are automatically zero).
    r = jnp.arange(m_out)
    sel = ((r[None, :] // seg == jnp.arange(BP)[:, None]) &
           ((r[None, :] % seg) < hs)).astype(jnp.float32)              # (BP, m_out)

    # lane-group matrix: sums each 16-lane w block into logit lane w (128-padded).
    gmat = jnp.zeros((l1, 128), jnp.float32)
    gmat = gmat.at[:, :ws].set(jnp.repeat(jnp.eye(ws, dtype=jnp.float32), CH2, axis=0))

    def kernel(x_ref, a0_ref, a1_ref, w2_ref, sel_ref, g_ref, o_ref, y0_ref):
        def conv3x3(src_ref, w_ref):
            # 3x3 'same' conv = 3 kh-grouped MXU matmuls; the kw taps and the width
            # zero-padding live in the block-banded weights, so no masks are needed.
            s_m = src_ref[PAD - 1:PAD - 1 + m_out, :].astype(jnp.bfloat16)
            s_0 = src_ref[PAD:PAD + m_out, :].astype(jnp.bfloat16)
            s_p = src_ref[PAD + 1:PAD + 1 + m_out, :].astype(jnp.bfloat16)
            return (jnp.dot(s_m, w_ref[0], preferred_element_type=jnp.float32)
                    + jnp.dot(s_0, w_ref[1], preferred_element_type=jnp.float32)
                    + jnp.dot(s_p, w_ref[2], preferred_element_type=jnp.float32))

        # conv0 + ReLU -> y0 canvas; only the pad bands are zeroed (they double as
        # conv1's height padding); the interior is fully overwritten every step.
        y0 = jnp.maximum(conv3x3(x_ref, a0_ref), 0.0)                  # (m_out, 128)
        band0 = jnp.zeros((PAD, l0), jnp.float32)
        y0_ref[0:PAD, :] = band0
        y0_ref[PAD:PAD + m_out, :] = y0
        y0_ref[PAD + m_out:canvas, :] = band0
        for b in range(1, b_tile):                                     # inter-batch bands
            y0_ref[b * seg:b * seg + PAD, :] = band0

        # conv1 + ReLU
        y1 = jnp.maximum(conv3x3(y0_ref, a1_ref), 0.0)                 # (m_out, 64)

        # conv2 ((48,1) kernel): per-row weights, then two small MXU contractions.
        zw = y1 * w2_ref[...]                                          # (m_out, 64)
        per_b = jnp.dot(sel_ref[...], zw, preferred_element_type=jnp.float32)    # (BP, 64)
        logits = jnp.dot(per_b, g_ref[...], preferred_element_type=jnp.float32)  # (BP, 128)

        # overflow-safe sigmoid (exp argument always <= 0); unused lanes hold 0.5.
        e = jnp.exp(-jnp.abs(logits))
        o_ref[0] = jnp.where(logits >= 0, 1.0 / (1.0 + e), e / (1.0 + e))

    out = pl.pallas_call(
        kernel,
        out_shape=jax.ShapeDtypeStruct((nt, BP, 128), jnp.float32),
        grid_spec=pltpu.PrefetchScalarGridSpec(
            num_scalar_prefetch=0,
            grid=(nt,),
            in_specs=[
                pl.BlockSpec((canvas, lx), lambda i: (i, 0)),
                pl.BlockSpec((3, lx, l0), lambda i: (0, 0, 0)),
                pl.BlockSpec((3, l0, l1), lambda i: (0, 0, 0)),
                pl.BlockSpec((m_out, l1), lambda i: (0, 0)),
                pl.BlockSpec((BP, m_out), lambda i: (0, 0)),
                pl.BlockSpec((l1, 128), lambda i: (0, 0)),
            ],
            out_specs=pl.BlockSpec((1, BP, 128), lambda i: (i, 0, 0)),
            scratch_shapes=[pltpu.VMEM((canvas, l0), jnp.float32)],
        ),
        compiler_params=pltpu.CompilerParams(
            dimension_semantics=("parallel",)),   # batch tiles shard across v7x TCs
    )(x_all, a0, a1, w2_rows, sel, gmat)

    # valid logits live in the (b_tile, ws) corner of each tile's dense (BP, 128) block
    return out[:, :b_tile, :ws].reshape(-1)


def reference_forward(x, w0, w1, w2):
    """Plain-JAX reference matching the PyTorch forward exactly (f32)."""
    xp = jnp.transpose(x, (0, 2, 3, 1))               # permute(0, 2, 3, 1)
    dn = ('NCHW', 'OIHW', 'NCHW')
    y = jax.lax.conv_general_dilated(xp, w0, (1, 1), ((1, 1), (1, 1)), dimension_numbers=dn)
    y = jnp.maximum(y, 0.0)
    y = jax.lax.conv_general_dilated(y, w1, (1, 1), ((1, 1), (1, 1)), dimension_numbers=dn)
    y = jnp.maximum(y, 0.0)
    y = jax.lax.conv_general_dilated(y, w2, (1, 1), ((0, 0), (0, 0)), dimension_numbers=dn)
    return jax.nn.sigmoid(y).reshape(-1)


if __name__ == "__main__":
    key = jax.random.PRNGKey(0)
    kx, k0, k1, k2 = jax.random.split(key, 4)
    x = jax.random.normal(kx, (N_BATCH, C_IN, H_IN, W_IN), jnp.float32)
    # deterministic synthetic parameters (shapes from nn.Conv2d in __init__)
    w0 = 0.05 * jax.random.normal(k0, (CH1, CH0, 3, 3), jnp.float32)
    w1 = 0.05 * jax.random.normal(k1, (CH2, CH1, 3, 3), jnp.float32)
    w2 = 0.05 * jax.random.normal(k2, (1, CH2, W_IN, 1), jnp.float32)

    out = jax.block_until_ready(discriminator_forward(x, w0, w1, w2))
    ref = jax.block_until_ready(reference_forward(x, w0, w1, w2))
    assert out.shape == (N_BATCH * C_IN,)
    # bf16 MXU operands -> ~1e-3 level agreement with the f32 reference
    assert jnp.allclose(out, ref, atol=5e-3, rtol=5e-3), (out, ref)
    print("KERNEL_OK")
</pallas_src>

<mosaic_0001>
module attributes {stable_mosaic.version = 11 : i64} {
  func.func @kernel(%arg0: i32, %arg1: memref<64x256xf32, #tpu.memory_space<vmem>>, %arg2: memref<3x256x128xbf16, #tpu.memory_space<vmem>>, %arg3: memref<3x128x64xbf16, #tpu.memory_space<vmem>>, %arg4: memref<48x64xf32, #tpu.memory_space<vmem>>, %arg5: memref<8x48xf32, #tpu.memory_space<vmem>>, %arg6: memref<64x128xf32, #tpu.memory_space<vmem>>, %arg7: memref<1x8x128xf32, #tpu.memory_space<vmem>>, %arg8: memref<64x128xf32, #tpu.memory_space<vmem>>) attributes {dimension_semantics = [#tpu.dimension_semantics<parallel>], iteration_bounds = array<i64: 2>, scalar_prefetch = 0 : i64, scratch_operands = 1 : i64, tpu.core_type = #tpu.core_type<tc>, window_params = [{transform_indices = @transform_0, window_bounds = array<i64: 64, 256>}, {pipeline_mode = #tpu.pipeline_mode<synchronous>, transform_indices = @transform_1, window_bounds = array<i64: 3, 256, 128>}, {pipeline_mode = #tpu.pipeline_mode<synchronous>, transform_indices = @transform_2, window_bounds = array<i64: 3, 128, 64>}, {pipeline_mode = #tpu.pipeline_mode<synchronous>, transform_indices = @transform_3, window_bounds = array<i64: 48, 64>}, {pipeline_mode = #tpu.pipeline_mode<synchronous>, transform_indices = @transform_4, window_bounds = array<i64: 8, 48>}, {pipeline_mode = #tpu.pipeline_mode<synchronous>, transform_indices = @transform_5, window_bounds = array<i64: 64, 128>}, {transform_indices = @transform_6, window_bounds = array<i64: 1, 8, 128>}]} {
    %c7 = arith.constant 7 : index
    %c0 = arith.constant 0 : index
    %0 = vector.load %arg1[%c7, %c0] : memref<64x256xf32, #tpu.memory_space<vmem>>, vector<48x256xf32>
    %1 = arith.truncf %0 : vector<48x256xf32> to vector<48x256xbf16>
    %c8 = arith.constant 8 : index
    %c0_0 = arith.constant 0 : index
    %2 = vector.load %arg1[%c8, %c0_0] : memref<64x256xf32, #tpu.memory_space<vmem>>, vector<48x256xf32>
    %3 = arith.truncf %2 : vector<48x256xf32> to vector<48x256xbf16>
    %c9 = arith.constant 9 : index
    %c0_1 = arith.constant 0 : index
    %4 = vector.load %arg1[%c9, %c0_1] : memref<64x256xf32, #tpu.memory_space<vmem>>, vector<48x256xf32>
    %5 = arith.truncf %4 : vector<48x256xf32> to vector<48x256xbf16>
    %c0_2 = arith.constant 0 : index
    %c0_3 = arith.constant 0 : index
    %c0_4 = arith.constant 0 : index
    %6 = vector.load %arg2[%c0_2, %c0_3, %c0_4] : memref<3x256x128xbf16, #tpu.memory_space<vmem>>, vector<1x256x128xbf16>
    %7 = vector.shape_cast %6 : vector<1x256x128xbf16> to vector<256x128xbf16>
    %cst = arith.constant dense<0.000000e+00> : vector<48x128xf32>
    %8 = tpu.matmul %1, %7, %cst {dimension_numbers = #tpu.dot_dimension_numbers<[1], [0], [0], [1], [0, 0, 1, 1], [], []>} : vector<48x256xbf16>, vector<256x128xbf16>, vector<48x128xf32> -> vector<48x128xf32>
    %c1 = arith.constant 1 : index
    %c0_5 = arith.constant 0 : index
    %c0_6 = arith.constant 0 : index
    %9 = vector.load %arg2[%c1, %c0_5, %c0_6] : memref<3x256x128xbf16, #tpu.memory_space<vmem>>, vector<1x256x128xbf16>
    %10 = vector.shape_cast %9 : vector<1x256x128xbf16> to vector<256x128xbf16>
    %cst_7 = arith.constant dense<0.000000e+00> : vector<48x128xf32>
    %11 = tpu.matmul %3, %10, %cst_7 {dimension_numbers = #tpu.dot_dimension_numbers<[1], [0], [0], [1], [0, 0, 1, 1], [], []>} : vector<48x256xbf16>, vector<256x128xbf16>, vector<48x128xf32> -> vector<48x128xf32>
    %12 = arith.addf %8, %11 : vector<48x128xf32>
    %c2 = arith.constant 2 : index
    %c0_8 = arith.constant 0 : index
    %c0_9 = arith.constant 0 : index
    %13 = vector.load %arg2[%c2, %c0_8, %c0_9] : memref<3x256x128xbf16, #tpu.memory_space<vmem>>, vector<1x256x128xbf16>
    %14 = vector.shape_cast %13 : vector<1x256x128xbf16> to vector<256x128xbf16>
    %cst_10 = arith.constant dense<0.000000e+00> : vector<48x128xf32>
    %15 = tpu.matmul %5, %14, %cst_10 {dimension_numbers = #tpu.dot_dimension_numbers<[1], [0], [0], [1], [0, 0, 1, 1], [], []>} : vector<48x256xbf16>, vector<256x128xbf16>, vector<48x128xf32> -> vector<48x128xf32>
    %16 = arith.addf %12, %15 : vector<48x128xf32>
    %cst_11 = arith.constant 0.000000e+00 : f32
    %17 = vector.broadcast %cst_11 : f32 to vector<48x128xf32>
    %18 = arith.maximumf %16, %17 : vector<48x128xf32>
    %cst_12 = arith.constant 0.000000e+00 : f32
    %19 = vector.broadcast %cst_12 : f32 to vector<8x128xf32>
    %c0_13 = arith.constant 0 : index
    %c0_14 = arith.constant 0 : index
    %20 = vector.load %arg8[%c0_13, %c0_14] : memref<64x128xf32, #tpu.memory_space<vmem>>, vector<8x128xf32>
    tpu.vector_store %arg8[%c0_13, %c0_14], %19 {strides = array<i32>} : memref<64x128xf32, #tpu.memory_space<vmem>>, vector<8x128xf32>,
    %c8_15 = arith.constant 8 : index
    %c0_16 = arith.constant 0 : index
    %21 = vector.load %arg8[%c8_15, %c0_16] : memref<64x128xf32, #tpu.memory_space<vmem>>, vector<48x128xf32>
    tpu.vector_store %arg8[%c8_15, %c0_16], %18 {strides = array<i32>} : memref<64x128xf32, #tpu.memory_space<vmem>>, vector<48x128xf32>,
    %c56 = arith.constant 56 : index
    %c0_17 = arith.constant 0 : index
    %22 = vector.load %arg8[%c56, %c0_17] : memref<64x128xf32, #tpu.memory_space<vmem>>, vector<8x128xf32>
    tpu.vector_store %arg8[%c56, %c0_17], %19 {strides = array<i32>} : memref<64x128xf32, #tpu.memory_space<vmem>>, vector<8x128xf32>,
    %c7_18 = arith.constant 7 : index
    %c0_19 = arith.constant 0 : index
    %23 = vector.load %arg8[%c7_18, %c0_19] : memref<64x128xf32, #tpu.memory_space<vmem>>, vector<48x128xf32>
    %24 = arith.truncf %23 : vector<48x128xf32> to vector<48x128xbf16>
    %c8_20 = arith.constant 8 : index
    %c0_21 = arith.constant 0 : index
    %25 = vector.load %arg8[%c8_20, %c0_21] : memref<64x128xf32, #tpu.memory_space<vmem>>, vector<48x128xf32>
    %26 = arith.truncf %25 : vector<48x128xf32> to vector<48x128xbf16>
    %c9_22 = arith.constant 9 : index
    %c0_23 = arith.constant 0 : index
    %27 = vector.load %arg8[%c9_22, %c0_23] : memref<64x128xf32, #tpu.memory_space<vmem>>, vector<48x128xf32>
    %28 = arith.truncf %27 : vector<48x128xf32> to vector<48x128xbf16>
    %c0_24 = arith.constant 0 : index
    %c0_25 = arith.constant 0 : index
    %c0_26 = arith.constant 0 : index
    %29 = vector.load %arg3[%c0_24, %c0_25, %c0_26] : memref<3x128x64xbf16, #tpu.memory_space<vmem>>, vector<1x128x64xbf16>
    %30 = vector.shape_cast %29 : vector<1x128x64xbf16> to vector<128x64xbf16>
    %cst_27 = arith.constant dense<0.000000e+00> : vector<48x64xf32>
    %31 = tpu.matmul %24, %30, %cst_27 {dimension_numbers = #tpu.dot_dimension_numbers<[1], [0], [0], [1], [0, 0, 1, 1], [], []>} : vector<48x128xbf16>, vector<128x64xbf16>, vector<48x64xf32> -> vector<48x64xf32>
    %c1_28 = arith.constant 1 : index
    %c0_29 = arith.constant 0 : index
    %c0_30 = arith.constant 0 : index
    %32 = vector.load %arg3[%c1_28, %c0_29, %c0_30] : memref<3x128x64xbf16, #tpu.memory_space<vmem>>, vector<1x128x64xbf16>
    %33 = vector.shape_cast %32 : vector<1x128x64xbf16> to vector<128x64xbf16>
    %cst_31 = arith.constant dense<0.000000e+00> : vector<48x64xf32>
    %34 = tpu.matmul %26, %33, %cst_31 {dimension_numbers = #tpu.dot_dimension_numbers<[1], [0], [0], [1], [0, 0, 1, 1], [], []>} : vector<48x128xbf16>, vector<128x64xbf16>, vector<48x64xf32> -> vector<48x64xf32>
    %35 = arith.addf %31, %34 : vector<48x64xf32>
    %c2_32 = arith.constant 2 : index
    %c0_33 = arith.constant 0 : index
    %c0_34 = arith.constant 0 : index
    %36 = vector.load %arg3[%c2_32, %c0_33, %c0_34] : memref<3x128x64xbf16, #tpu.memory_space<vmem>>, vector<1x128x64xbf16>
    %37 = vector.shape_cast %36 : vector<1x128x64xbf16> to vector<128x64xbf16>
    %cst_35 = arith.constant dense<0.000000e+00> : vector<48x64xf32>
    %38 = tpu.matmul %28, %37, %cst_35 {dimension_numbers = #tpu.dot_dimension_numbers<[1], [0], [0], [1], [0, 0, 1, 1], [], []>} : vector<48x128xbf16>, vector<128x64xbf16>, vector<48x64xf32> -> vector<48x64xf32>
    %39 = arith.addf %35, %38 : vector<48x64xf32>
    %cst_36 = arith.constant 0.000000e+00 : f32
    %40 = vector.broadcast %cst_36 : f32 to vector<48x64xf32>
    %41 = arith.maximumf %39, %40 : vector<48x64xf32>
    %c0_37 = arith.constant 0 : index
    %c0_38 = arith.constant 0 : index
    %42 = vector.load %arg4[%c0_37, %c0_38] : memref<48x64xf32, #tpu.memory_space<vmem>>, vector<48x64xf32>
    %43 = arith.mulf %41, %42 : vector<48x64xf32>
    %c0_39 = arith.constant 0 : index
    %c0_40 = arith.constant 0 : index
    %44 = vector.load %arg5[%c0_39, %c0_40] : memref<8x48xf32, #tpu.memory_space<vmem>>, vector<8x48xf32>
    %cst_41 = arith.constant dense<0.000000e+00> : vector<8x64xf32>
    %45 = tpu.matmul %44, %43, %cst_41 {dimension_numbers = #tpu.dot_dimension_numbers<[1], [0], [0], [1], [0, 0, 1, 1], [], []>} : vector<8x48xf32>, vector<48x64xf32>, vector<8x64xf32> -> vector<8x64xf32>
    %c0_42 = arith.constant 0 : index
    %c0_43 = arith.constant 0 : index
    %46 = vector.load %arg6[%c0_42, %c0_43] : memref<64x128xf32, #tpu.memory_space<vmem>>, vector<64x128xf32>
    %cst_44 = arith.constant dense<0.000000e+00> : vector<8x128xf32>
    %47 = tpu.matmul %45, %46, %cst_44 {dimension_numbers = #tpu.dot_dimension_numbers<[1], [0], [0], [1], [0, 0, 1, 1], [], []>} : vector<8x64xf32>, vector<64x128xf32>, vector<8x128xf32> -> vector<8x128xf32>
    %48 = math.absf %47 : vector<8x128xf32>
    %cst_45 = arith.constant 0.000000e+00 : f32
    %49 = vector.broadcast %cst_45 : f32 to vector<8x128xf32>
    %50 = arith.subf %49, %48 : vector<8x128xf32>
    %51 = math.exp %50 : vector<8x128xf32>
    %cst_46 = arith.constant 0.000000e+00 : f32
    %52 = vector.broadcast %cst_46 : f32 to vector<8x128xf32>
    %53 = arith.cmpf oge, %47, %52 : vector<8x128xf32>
    %cst_47 = arith.constant 1.000000e+00 : f32
    %54 = vector.broadcast %cst_47 : f32 to vector<8x128xf32>
    %55 = arith.addf %54, %51 : vector<8x128xf32>
    %cst_48 = arith.constant 1.000000e+00 : f32
    %56 = vector.broadcast %cst_48 : f32 to vector<8x128xf32>
    %57 = arith.divf %56, %55 : vector<8x128xf32>
    %cst_49 = arith.constant 1.000000e+00 : f32
    %58 = vector.broadcast %cst_49 : f32 to vector<8x128xf32>
    %59 = arith.addf %58, %51 : vector<8x128xf32>
    %60 = arith.divf %51, %59 : vector<8x128xf32>
    %61 = arith.select %53, %57, %60 : vector<8x128xi1>, vector<8x128xf32>
    %c0_50 = arith.constant 0 : index
    %c0_51 = arith.constant 0 : index
    %c0_52 = arith.constant 0 : index
    %62 = vector.load %arg7[%c0_50, %c0_51, %c0_52] : memref<1x8x128xf32, #tpu.memory_space<vmem>>, vector<1x8x128xf32>
    %63 = vector.shape_cast %62 : vector<1x8x128xf32> to vector<8x128xf32>
    %64 = vector.shape_cast %61 : vector<8x128xf32> to vector<1x8x128xf32>
    tpu.vector_store %arg7[%c0_50, %c0_51, %c0_52], %64 {strides = array<i32>} : memref<1x8x128xf32, #tpu.memory_space<vmem>>, vector<1x8x128xf32>,
    return
  }
  func.func @transform_0(%arg0: i32) -> (i32, i32) {
    %c0_i32 = arith.constant 0 : i32
    %c0_i32_0 = arith.constant 0 : i32
    return %arg0, %c0_i32 : i32, i32
  }
  func.func @transform_1(%arg0: i32) -> (i32, i32, i32) {
    %c0_i32 = arith.constant 0 : i32
    %c0_i32_0 = arith.constant 0 : i32
    %c0_i32_1 = arith.constant 0 : i32
    %c0_i32_2 = arith.constant 0 : i32
    return %c0_i32, %c0_i32_0, %c0_i32_1 : i32, i32, i32
  }
  func.func @transform_2(%arg0: i32) -> (i32, i32, i32) {
    %c0_i32 = arith.constant 0 : i32
    %c0_i32_0 = arith.constant 0 : i32
    %c0_i32_1 = arith.constant 0 : i32
    %c0_i32_2 = arith.constant 0 : i32
    return %c0_i32, %c0_i32_0, %c0_i32_1 : i32, i32, i32
  }
  func.func @transform_3(%arg0: i32) -> (i32, i32) {
    %c0_i32 = arith.constant 0 : i32
    %c0_i32_0 = arith.constant 0 : i32
    %c0_i32_1 = arith.constant 0 : i32
    return %c0_i32, %c0_i32_0 : i32, i32
  }
  func.func @transform_4(%arg0: i32) -> (i32, i32) {
    %c0_i32 = arith.constant 0 : i32
    %c0_i32_0 = arith.constant 0 : i32
    %c0_i32_1 = arith.constant 0 : i32
    return %c0_i32, %c0_i32_0 : i32, i32
  }
  func.func @transform_5(%arg0: i32) -> (i32, i32) {
    %c0_i32 = arith.constant 0 : i32
    %c0_i32_0 = arith.constant 0 : i32
    %c0_i32_1 = arith.constant 0 : i32
    return %c0_i32, %c0_i32_0 : i32, i32
  }
  func.func @transform_6(%arg0: i32) -> (i32, i32, i32) {
    %c0_i32 = arith.constant 0 : i32
    %c0_i32_0 = arith.constant 0 : i32
    %c0_i32_1 = arith.constant 0 : i32
    return %arg0, %c0_i32, %c0_i32_0 : i32, i32, i32
  }
}

</mosaic_0001>

<bundles_post_ra>
// kernel: discriminator_forward.1
= control target key start
LH: loop header
LB: loop body
LE: loop exit
PB: predicated region body
PF: predicated region fallthrough
CT: control target
= control target key end

     0   :  { %s1983_s21 = smov 0   ;;  %s2371_s0 = inlined_call_operand.vmem [shape: f32[128,256], index: 0, kind: input, shape index: {}]   ;;  %s2372_s1 = inlined_call_operand.vmem [shape: bf16[3,256,128], index: 1, kind: input, shape index: {}]   ;;  %s2373_s2 = inlined_call_operand.vmem [shape: bf16[3,128,64], index: 2, kind: input, shape index: {}]   ;;  %s2374_s3 = inlined_call_operand.vmem [shape: f32[48,64], index: 3, kind: input, shape index: {}]   ;;  %s2375_s4 = inlined_call_operand.vmem [shape: f32[8,48], index: 4, kind: input, shape index: {}]   ;;  %s2376_s5 = inlined_call_operand.vmem [shape: f32[64,128], index: 5, kind: input, shape index: {}]   ;;  %s2377_s6 = inlined_call_operand.vmem [shape: f32[2,8,128], index: 6, kind: output, shape index: {}]  }
   0x1 LB: > { %s1989_s22 = sadd.s32 4294967295, %s1945_s21   ;;  %p1452_p0 = scmp.ge.s32.totalorder %s1945_s21, 1  ;;  %s1945_s21 = sphi %s1983_s21, %s16_s21  }
   0x2   : > { %p214_p1 = scmp.lt.s32.totalorder %s1945_s21, 3 }
   0x4   : > { %p215_p2 = pnand %p1452_p0, %p214_p1 }
   0x5   : > { %s1453_s29 = sshll.u32 (!%p215_p2), %s1989_s22, 3  ;;  %p251_p4 = scmp.lt.s32.totalorder (!%p215_p2), %s1989_s22, 1 }
   0x6   : > { %218 = sbr.rel (%p215_p2) target bundleno = 728 (0x2d8), region = 44  ;;  %p245_p3 = scmp.lt.s32.totalorder (!%p215_p2), %s1453_s29, 15 }
   0xb   : > { %v1869_v0 = vld [vmem:[%s2372_s1 + $0xb8] sm:$0xff]  ;;  %v1868_v3 = vld [vmem:[%s2372_s1 + $0xb0] sm:$0xff]  ;;  %s2379_s29 = smov (!%p245_p3, %s1453_s29), 15  ;;  %v1867_v6 = vld [vmem:[%s2372_s1 + $0xa8] sm:$0xff]  ;;  %vm516_vm0 = vsmask.f32 4352 }
   0xc   : > { %v1877_v1 = vld [vmem:[%s2372_s1 + $0xf8] sm:$0xff]  ;;  %468 = vmatpush.bf16.msra.mxu0 %v1869_v0  ;;  %1918 = vmatpush.bf16.msra.mxu3 %v1869_v0  ;;  %v1876_v4 = vld [vmem:[%s2372_s1 + $0xf0] sm:$0xff]  ;;  %s1845_s12 = sshll.u32 %s2379_s29, 4  ;;  %v1875_v7 = vld [vmem:[%s2372_s1 + $0xe8] sm:$0xff]  ;;  %vm770_vm1 = vsmask.f32 7424 }
   0xd   : > { %v1853_v2 = vld [vmem:[%s2372_s1 + $0x38] sm:$0xff]  ;;  %492 = vmatpush.bf16.msra.mxu1 %v1877_v1  ;;  %v1852_v5 = vld [vmem:[%s2372_s1 + $0x30] sm:$0xff]  ;;  %v1851_v8 = vld [vmem:[%s2372_s1 + $0x28] sm:$0xff]  ;;  %s2024_s23 = scalar_lea.vmem %s2371_s0, %s1845_s12  ;;  %vm1315_vm2 = vcmask 392192   ;;  %vm1347_vm3 = vcmask 523264   ;;  %s2381_s22 = smov (!%p251_p4, %s1989_s22), 1 }
   0xe   : > { %689 = vmatpush.bf16.msra.mxu2 %v1853_v2  ;;  %v1866_v9 = vld [vmem:[%s2372_s1 + $0xa0] sm:$0xff]  ;;  %v2037_v13 = vld [vmem:[%s2024_s23 + $0x10] sm:$0xff]  ;;  %v1865_v16 = vld [vmem:[%s2372_s1 + $0x98] sm:$0xff]  ;;  %s1456_s29 = sshll.u32 %s2381_s22, 3 }
   0xf   : > { %v1874_v10 = vld [vmem:[%s2372_s1 + $0xe0] sm:$0xff]  ;;  %v2043_v15 = vld [vmem:[%s2024_s23 + $0x30] sm:$0xff]  ;;  %v1873_v17 = vld [vmem:[%s2372_s1 + $0xd8] sm:$0xff]  ;;  %s254_s8 = scalar_lea.vmem %s2377_s6, %s1456_s29 }
  0x10   : > { %469 = vmatpush.bf16.msra.mxu0 %v1868_v3  ;;  %1919 = vmatpush.bf16.msra.mxu3 %v1868_v3  ;;  %v1850_v11 = vld [vmem:[%s2372_s1 + $0x20] sm:$0xff]  ;;  %v1849_v18 = vld [vmem:[%s2372_s1 + $0x18] sm:$0xff]  ;;  %v1864_v21 = vld [vmem:[%s2372_s1 + $0x90] sm:$0xff] }
  0x11   : > { %493 = vmatpush.bf16.msra.mxu1 %v1876_v4  ;;  %v255_v12 = vld [vmem:[%s2024_s23] sm:$0x80]  ;;  %v1872_v22 = vld [vmem:[%s2372_s1 + $0xd0] sm:$0xff]  ;;  %v1863_v28 = vld [vmem:[%s2372_s1 + $0x88] sm:$0xff] }
  0x12   : > { %690 = vmatpush.bf16.msra.mxu2 %v1852_v5  ;;  %v2040_v14 = vld [vmem:[%s2024_s23 + $0x20] sm:$0xff]  ;;  %v269_v19 = vpack.c.bf16 %v2037_v13, %v255_v12  ;;  %v1848_v23 = vld [vmem:[%s2372_s1 + $0x10] sm:$0xff]  ;;  %v1871_v29 = vld [vmem:[%s2372_s1 + $0xc8] sm:$0xff] }
  0x13   : > { %v271_v20 = vpack.c.bf16 %v2043_v15, %v2040_v14  ;;  %v1847_v30 = vld [vmem:[%s2372_s1 + $0x8] sm:$0xff]  ;;  %v1862_v35 = vld [vmem:[%s2372_s1 + $0x80] sm:$0xff]  ;;  %v1861_v39 = vld [vmem:[%s2372_s1 + $0x78] sm:$0xff]  ;;  %v279_v47 = vpack.c.bf16 %v2040_v14, %v2037_v13 }
  0x14   : > { %470 = vmatpush.bf16.msra.mxu0 %v1867_v6  ;;  %1920 = vmatpush.bf16.msra.mxu3 %v1867_v6  ;;  %v518_v24 = vshrl.u32 %v269_v19, 16  ;;  %v521_v25 = vshll.u32 %v269_v19, 16  ;;  %v1870_v36 = vld [vmem:[%s2372_s1 + $0xc0] sm:$0xff]  ;;  %v258_v40 = vld [vmem:[%s2024_s23 + $0x18] sm:$0xff]  ;;  %v2090_v41 = vld [vmem:[%s2024_s23 + $0x28] sm:$0xff] }
  0x15   : > { %494 = vmatpush.bf16.msra.mxu1 %v1875_v7  ;;  %v526_v26 = vshrl.u32 %v271_v20, 16  ;;  %v529_v27 = vshll.u32 %v271_v20, 16  ;;  %v1846_v37 = vld [vmem:[%s2372_s1] sm:$0xff]  ;;  %v1885_v44 = vld [vmem:[%s2372_s1 + $0x138] sm:$0xff]  ;;  %v265_v45 = vld [vmem:[%s2024_s23 + $0x50] sm:$0xff]  ;;  %v280_v49 = vpack.c.bf16 %v2090_v41, %v258_v40 }
  0x16   : > { %691 = vmatpush.bf16.msra.mxu2 %v1851_v8  ;;  %v520_v31 = vrot.slane %v518_v24, 3  ;;  %v523_v32 = vrot.slane %v521_v25, 4  ;;  %v277_v38 = vld [vmem:[%s2024_s23 + $0x60] sm:$0xff]  ;;  %v1893_v52 = vld [vmem:[%s2372_s1 + $0x178] sm:$0xff]  ;;  %v1860_v53 = vld [vmem:[%s2372_s1 + $0x70] sm:$0xff] }
  0x17   : > { %v528_v33 = vrot.slane %v526_v26, 3  ;;  %v531_v34 = vrot.slane %v529_v27, 4  ;;  %v263_v46 = vld [vmem:[%s2024_s23 + $0x40] sm:$0xff]  ;;  %v2099_v48 = vpack.c.bf16 %v277_v38, %v265_v45  ;;  %v1884_v54 = vld [vmem:[%s2372_s1 + $0x130] sm:$0xff]  ;;  %v1859_v58 = vld [vmem:[%s2372_s1 + $0x68] sm:$0xff] }
  0x18   : > { %471 = vmatpush.bf16.msra.mxu0 %v1866_v9  ;;  %1921 = vmatpush.bf16.msra.mxu3 %v1866_v9  ;;  %v524_v42 = vor.u32 %v523_v32, %v520_v31  ;;  %v273_v51 = vpack.c.bf16 %v265_v45, %v263_v46  ;;  %v1892_v57 = vld [vmem:[%s2372_s1 + $0x170] sm:$0xff]  ;;  %v1883_v59 = vld [vmem:[%s2372_s1 + $0x128] sm:$0xff]  ;;  %v1858_v63 = vld [vmem:[%s2372_s1 + $0x60] sm:$0xff]  ;;  %v2151_v12 = vpack.c.bf16 %v263_v46, %v2043_v15 }
  0x19   : > { %495 = vmatpush.bf16.msra.mxu1 %v1874_v10  ;;  %v532_v43 = vor.u32 %v531_v34, %v528_v33  ;;  %v1891_v62 = vld [vmem:[%s2372_s1 + $0x168] sm:$0xff]  ;;  %v1882_v0 = vld [vmem:[%s2372_s1 + $0x120] sm:$0xff]  ;;  %v262_v2 = vld [vmem:[%s2024_s23 + $0x38] sm:$0xff] }
  0x1a   : > { %692 = vmatpush.bf16.msra.mxu2 %v1850_v11  ;;  %v552_v55 = vshrl.u32 %v273_v51, 16  ;;  %v555_v56 = vshll.u32 %v273_v51, 16  ;;  %v256_v1 = vld [vmem:[%s2024_s23 + $0x8] sm:$0x80]  ;;  %v1890_v5 = vld [vmem:[%s2372_s1 + $0x160] sm:$0xff]  ;;  %v1857_v8 = vld [vmem:[%s2372_s1 + $0x58] sm:$0xff]  ;;  %v272_v9 = vpack.c.bf16 %v262_v2, %v2090_v41 }
  0x1b   : > { %v533_v50 = vsel %vm516_vm0, %v524_v42, %v532_v43  ;;  %v2134_v3 = vld [vmem:[%s2024_s23 + $0x48] sm:$0xff]  ;;  %v285_v6 = vld [vmem:[%s2024_s23 + $0x10] sm:$0xfe]  ;;  %v270_v7 = vpack.c.bf16 %v258_v40, %v256_v1  ;;  %v1881_v10 = vld [vmem:[%s2372_s1 + $0x118] sm:$0xff]  ;;  %v799_v1 = vshll.u32 %v2099_v48, 16 }
  0x1c   : > { %472 = vmatpush.bf16.msra.mxu0 %v1865_v16  ;;  %1922 = vmatpush.bf16.msra.mxu3 %v1865_v16  ;;  %v554_v60 = vrot.slane %v552_v55, 3  ;;  %v557_v61 = vrot.slane %v555_v56, 4  ;;  %v267_v11 = vld [vmem:[%s2024_s23 + $0x60] sm:$0x7f]  ;;  %v2154_v13 = vpack.c.bf16 %v2134_v3, %v262_v2  ;;  %v299_v16 = vpack.c.bf16 %v2040_v14, %v285_v6  ;;  %v1889_v19 = vld [vmem:[%s2372_s1 + $0x158] sm:$0xff]  ;;  %v1880_v14 = vld [vmem:[%s2372_s1 + $0x110] sm:$0xff] }
  0x1d   : > { %496 = vmatpush.bf16.msra.mxu1 %v1873_v17  ;;  %v535_v20 = vshrl.u32 %v270_v7, 16  ;;  %v546_v15 = vshll.u32 %v272_v9, 16  ;;  %v1888_v27 = vld [vmem:[%s2372_s1 + $0x150] sm:$0xff]  ;;  %v1855_v32 = vld [vmem:[%s2372_s1 + $0x48] sm:$0xff]  ;;  %v1854_v40 = vld [vmem:[%s2372_s1 + $0x40] sm:$0xff] }
  0x1e   : > { %693 = vmatpush.bf16.msra.mxu2 %v1849_v18  ;;  %v2136_v4 = vor.u32 %v557_v61, %v554_v60  ;;  %v275_v18 = vpack.c.bf16 %v267_v11, %v267_v11  ;;  %v774_v24 = vshll.u32 %v299_v16, 16  ;;  %v1879_v33 = vld [vmem:[%s2372_s1 + $0x108] sm:$0xff]  ;;  %v772_v34 = vshrl.u32 %v299_v16, 16  ;;  %v1886_v51 = vld [vmem:[%s2372_s1 + $0x140] sm:$0xff] }
  0x1f   : > { %v548_v31 = vrot.slane %v546_v15, 4  ;;  %v268_v6 = vld [vmem:[%s2024_s23 + $0x68] sm:$0x7f]  ;;  %v811_v15 = vshrl.u32 %v2099_v48, 16 }
  0x20   : > { %473 = vmatpush.bf16.msra.mxu0 %v1864_v21  ;;  %1923 = vmatpush.bf16.msra.mxu3 %v1864_v21  ;;  %v559_v17 = vsel %vm516_vm0, %v532_v43, %v2136_v4  ;;  %v538_v21 = vshll.u32 %v270_v7, 16  ;;  %v570_v25 = vshrl.u32 %v275_v18, 16  ;;  %v573_v26 = vshll.u32 %v275_v18, 16 }
  0x21   : > { %497 = vmatpush.bf16.msra.mxu1 %v1872_v22  ;;  %v543_v22 = vshrl.u32 %v272_v9, 16  ;;  %v801_v7 = vrot.slane %v799_v1, 1  ;;  %v276_v11 = vpack.c.bf16 %v268_v6, %v268_v6  ;;  %v1896_v1 = vld [vmem:[%s2373_s2 + $0x10] sm:$0xff]  ;;  %v1895_v6 = vld [vmem:[%s2373_s2 + $0x8] sm:$0xff] }
  0x22   : > { %694 = vmatpush.bf16.msra.mxu2 %v1848_v23  ;;  %v1856_v23 = vld [vmem:[%s2372_s1 + $0x50] sm:$0xff]  ;;  %v575_v38 = vrot.slane %v573_v26, 4 }
  0x23   : > { %v579_v18 = vshrl.u32 %v276_v11, 16  ;;  %v813_v26 = vor.u32 %v811_v15, %v801_v7 }
  0x24   : > { %474 = vmatpush.bf16.msra.mxu0 %v1863_v28  ;;  %1924 = vmatpush.bf16.msra.mxu3 %v1863_v28  ;;  %v537_v28 = vrot.slane %v535_v20, 3 }
  0x25   : > { %498 = vmatpush.bf16.msra.mxu1 %v1871_v29  ;;  %v540_v29 = vrot.slane %v538_v21, 4  ;;  %v581_v21 = vrot.slane %v579_v18, 3  ;;  %v1910_v18 = vld [vmem:[%s2373_s2 + $0x80] sm:$0xff] }
  0x26   : > { %695 = vmatpush.bf16.msra.mxu2 %v1847_v30  ;;  %v545_v30 = vrot.slane %v543_v22, 3 }
  0x27   : > { %v541_v42 = vor.u32 %v540_v29, %v537_v28 }
  0x28   : > { %475 = vmatpush.bf16.msra.mxu0 %v1862_v35  ;;  %1925 = vmatpush.bf16.msra.mxu3 %v1862_v35  ;;  %v776_v35 = vrot.slane %v774_v24, 1  ;;  %v549_v43 = vor.u32 %v548_v31, %v545_v30 }
  0x29   : > { %499 = vmatpush.bf16.msra.mxu1 %v1870_v36  ;;  %v779_v36 = vshll.u32 %v2151_v12, 16 }
  0x2a   : > { %696 = vmatpush.bf16.msra.mxu2 %v1846_v37  ;;  %v572_v37 = vrot.slane %v570_v25, 3  ;;  %v777_v45 = vor.u32 %v776_v35, %v772_v34 }
  0x2b   : > { %476 = vmatmul.bf16.vlgmr.msra.gmra.mxu0 %v279_v47  ;;  %486 = vmatmul.bf16.vlgmr.msra.gmra.mxu3 %v2099_v48  ;;  %v781_v46 = vrot.slane %v779_v36, 1  ;;  %v266_v47 = vld [vmem:[%s2024_s23 + $0x58] sm:$0xff] }
  0x2c   : > { %713 = vmatpush.bf16.msrb.mxu3 %v1861_v39  ;;  %929 = vmatpush.bf16.msrb.mxu0 %v1885_v44  ;;  %v1887_v39 = vld [vmem:[%s2372_s1 + $0x148] sm:$0xff]  ;;  %v1878_v44 = vld [vmem:[%s2372_s1 + $0x100] sm:$0xff] }
  0x2d   : > { %500 = vmatmul.bf16.vlgmr.msra.gmra.mxu1 %v280_v49  ;;  %697 = vmatmul.bf16.vlgmr.msra.gmra.mxu2 %v533_v50  ;;  %v278_v49 = vld [vmem:[%s2024_s23 + $0x68] sm:$0xff]  ;;  %v576_v50 = vor.u32 %v575_v38, %v572_v37  ;;  %v782_v56 = vsel %vm770_vm1, %v777_v45, %v781_v46 }
  0x2e   : > { %953 = vmatpush.bf16.msrb.mxu1 %v1893_v52  ;;  %v550_v52 = vsel %vm516_vm0, %v541_v42, %v549_v43  ;;  %v284_v55 = vpack.c.bf16 %v278_v49, %v266_v47  ;;  %v1908_v42 = vld [vmem:[%s2373_s2 + $0x70] sm:$0xff]  ;;  %v1907_v45 = vld [vmem:[%s2373_s2 + $0x68] sm:$0xff]  ;;  %v1906_v49 = vld [vmem:[%s2373_s2 + $0x60] sm:$0xff] }
  0x30   : > { %714 = vmatpush.bf16.msrb.mxu3 %v1860_v53  ;;  %930 = vmatpush.bf16.msrb.mxu0 %v1884_v54  ;;  %v274_v53 = vpack.c.bf16 %v266_v47, %v2134_v3  ;;  %v286_v54 = vld [vmem:[%s2024_s23 + $0x18] sm:$0xfe]  ;;  %v807_v24 = vshll.u32 %v284_v55, 16  ;;  %v819_v34 = vshrl.u32 %v284_v55, 16  ;;  %v1900_v47 = vld [vmem:[%s2373_s2 + $0x30] sm:$0xff] }
  0x32   : > { %954 = vmatpush.bf16.msrb.mxu1 %v1892_v57  ;;  %v577_v57 = vsel %vm516_vm0, %v2136_v4, %v576_v50  ;;  %v564_v60 = vshll.u32 %v274_v53, 16  ;;  %v791_v4 = vshll.u32 %v2154_v13, 16  ;;  %v809_v29 = vrot.slane %v807_v24, 1 }
  0x34   : > { %715 = vmatpush.bf16.msrb.mxu3 %v1859_v58  ;;  %931 = vmatpush.bf16.msrb.mxu0 %v1883_v59  ;;  %v300_v58 = vpack.c.bf16 %v2090_v41, %v286_v54  ;;  %v561_v59 = vshrl.u32 %v274_v53, 16  ;;  %v793_v9 = vrot.slane %v791_v4, 1  ;;  %v1917_v53 = vld [vmem:[%s2373_s2 + $0xb8] sm:$0xff] }
  0x35   : > { %v1905_v54 = vld [vmem:[%s2373_s2 + $0x58] sm:$0xff] }
  0x36   : > { %955 = vmatpush.bf16.msrb.mxu1 %v1891_v62  ;;  %v786_v61 = vshll.u32 %v300_v58, 16  ;;  %v563_v62 = vrot.slane %v561_v59, 3  ;;  %v784_v2 = vshrl.u32 %v300_v58, 16  ;;  %v1904_v58 = vld [vmem:[%s2373_s2 + $0x50] sm:$0xff]  ;;  %v1947_v59 = vmov 0.0  }
  0x37   : > { %989 = vst [vmem:[#allocation2] sm:$0xff] %v1947_v59 }
  0x38   : > { %716 = vmatpush.bf16.msrb.mxu3 %v1858_v63  ;;  %932 = vmatpush.bf16.msrb.mxu0 %v1882_v0  ;;  %v566_v63 = vrot.slane %v564_v60, 4  ;;  %v795_v0 = vshrl.u32 %v2151_v12, 16  ;;  %v788_v3 = vrot.slane %v786_v61, 1  ;;  %v1897_v61 = vld [vmem:[%s2373_s2 + $0x18] sm:$0xff]  ;;  %996 = vst [vmem:[#allocation2 + $0x38] sm:$0xff] %v1947_v59 }
  0x3a   : > { %956 = vmatpush.bf16.msrb.mxu1 %v1890_v5  ;;  %v567_v5 = vor.u32 %v566_v63, %v563_v62  ;;  %v797_v41 = vor.u32 %v795_v0, %v781_v46  ;;  %v1915_v62 = vld [vmem:[%s2373_s2 + $0xa8] sm:$0xff] }
  0x3b   : > { %481 = vmatmul.bf16.gmra.mxu0 %v2151_v12  ;;  %v1903_v63 = vld [vmem:[%s2373_s2 + $0x48] sm:$0xff] }
  0x3c   : > { %717 = vmatpush.bf16.msrb.mxu3 %v1857_v8  ;;  %933 = vmatpush.bf16.msrb.mxu0 %v1881_v10  ;;  %v789_v8 = vor.u32 %v788_v3, %v784_v2  ;;  %v568_v10 = vsel %vm516_vm0, %v549_v43, %v567_v5  ;;  %v802_v16 = vsel %vm770_vm1, %v797_v41, %v801_v7  ;;  %v1914_v2 = vld [vmem:[%s2373_s2 + $0xa0] sm:$0xff]  ;;  %v1913_v41 = vld [vmem:[%s2373_s2 + $0x98] sm:$0xff] }
  0x3d   : > { %505 = vmatmul.bf16.gmra.mxu1 %v2154_v13  ;;  %702 = vmatmul.bf16.gmra.mxu2 %v559_v17  ;;  %v297_v17 = vld [vmem:[%s2024_s23 + $0x70] sm:$0x1]  ;;  %v1902_v3 = vld [vmem:[%s2373_s2 + $0x40] sm:$0xff] }
  0x3e   : > { %957 = vmatpush.bf16.msrb.mxu1 %v1889_v19  ;;  %v794_v12 = vsel %vm770_vm1, %v789_v8, %v793_v9  ;;  %v582_v19 = vshll.u32 %v276_v11, 16  ;;  %v305_v20 = vpack.c.bf16 %v297_v17, %v297_v17 }
  0x40   : > { %718 = vmatpush.bf16.msrb.mxu3 %v1856_v23  ;;  %934 = vmatpush.bf16.msrb.mxu0 %v1880_v14  ;;  %v584_v22 = vrot.slane %v582_v19, 4  ;;  %v815_v23 = vshll.u32 %v305_v20, 16  ;;  %v803_v14 = vshrl.u32 %v2154_v13, 16  ;;  %v821_v13 = vor.u32 %v819_v34, %v809_v29 }
  0x42   : > { %958 = vmatpush.bf16.msrb.mxu1 %v1888_v27  ;;  %v585_v25 = vor.u32 %v584_v22, %v581_v21  ;;  %v817_v27 = vrot.slane %v815_v23, 1  ;;  %v805_v28 = vor.u32 %v803_v14, %v793_v9  ;;  %v1894_v9 = vld [vmem:[%s2373_s2] sm:$0xff] }
  0x44   : > { %719 = vmatpush.bf16.msrb.mxu3 %v1855_v32  ;;  %935 = vmatpush.bf16.msrb.mxu0 %v1879_v33  ;;  %v586_v30 = vsel %vm516_vm0, %v567_v5, %v585_v25  ;;  %v818_v31 = vsel %vm770_vm1, %v813_v26, %v817_v27  ;;  %v810_v32 = vsel %vm770_vm1, %v805_v28, %v809_v29  ;;  %v298_v33 = vld [vmem:[%s2024_s23 + $0x78] sm:$0x1] }
  0x45   : > { %v306_v48 = vpack.c.bf16 %v298_v33, %v298_v33 }
  0x46   : > { %959 = vmatpush.bf16.msrb.mxu1 %v1887_v39 }
  0x47   : > { %v823_v35 = vshll.u32 %v306_v48, 16 }
  0x48   : > { %720 = vmatpush.bf16.msrb.mxu3 %v1854_v40  ;;  %936 = vmatpush.bf16.msrb.mxu0 %v1878_v44  ;;  %v1909_v40 = vld [vmem:[%s2373_s2 + $0x78] sm:$0xff] }
  0x49   : > { %v825_v36 = vrot.slane %v823_v35, 1  ;;  %1105 = vmatpush.bf16.msrb.mxu2 %v1909_v40  ;;  %v1901_v44 = vld [vmem:[%s2373_s2 + $0x38] sm:$0xff] }
  0x4a   : > { %960 = vmatpush.bf16.msrb.mxu1 %v1886_v51 }
  0x4b   : > { %721 = vmatmul.bf16.vlgmr.msrb.gmra.mxu3 %v550_v52  ;;  %937 = vmatmul.bf16.vlgmr.msrb.gmra.mxu0 %v782_v56  ;;  %v826_v37 = vsel %vm770_vm1, %v821_v13, %v825_v36  ;;  %v1899_v52 = vld [vmem:[%s2373_s2 + $0x28] sm:$0xff]  ;;  %v1898_v56 = vld [vmem:[%s2373_s2 + $0x20] sm:$0xff] }
  0x4c   : > { %1177 = vmatpush.bf16.msra.mxu3 %v1901_v44  ;;  %1266 = vmatpush.bf16.msra.mxu0 %v1917_v53 }
  0x4d   : > { %510 = vmatmul.bf16.gmra.mxu1 %v284_v55  ;;  %707 = vmatmul.bf16.gmra.mxu2 %v577_v57  ;;  %v1916_v57 = vld [vmem:[%s2373_s2 + $0xb0] sm:$0xff] }
  0x4e   : > { %1106 = vmatpush.bf16.msrb.mxu2 %v1908_v42 }
  0x50   : > { %1178 = vmatpush.bf16.msra.mxu3 %v1900_v47  ;;  %1267 = vmatpush.bf16.msra.mxu0 %v1916_v57 }
  0x52   : > { %1107 = vmatpush.bf16.msrb.mxu2 %v1907_v45 }
  0x54   : > { %1179 = vmatpush.bf16.msra.mxu3 %v1899_v52  ;;  %1268 = vmatpush.bf16.msra.mxu0 %v1915_v62 }
  0x56   : > { %1108 = vmatpush.bf16.msrb.mxu2 %v1906_v49 }
  0x58   : > { %1180 = vmatpush.bf16.msra.mxu3 %v1898_v56  ;;  %1269 = vmatpush.bf16.msra.mxu0 %v1914_v2 }
  0x5a   : > { %1109 = vmatpush.bf16.msrb.mxu2 %v1905_v54 }
  0x5b   : > { %726 = vmatmul.bf16.gmra.mxu3 %v568_v10  ;;  %942 = vmatmul.bf16.gmra.mxu0 %v802_v16  ;;  %v1912_v10 = vld [vmem:[%s2373_s2 + $0x90] sm:$0xff] }
  0x5c   : > { %1181 = vmatpush.bf16.msra.mxu3 %v1897_v61  ;;  %1270 = vmatpush.bf16.msra.mxu0 %v1913_v41 }
  0x5d   : > { %961 = vmatmul.bf16.vlgmr.msrb.gmra.mxu1 %v794_v12  ;;  %v1911_v12 = vld [vmem:[%s2373_s2 + $0x88] sm:$0xff] }
  0x5e   : > { %1110 = vmatpush.bf16.msrb.mxu2 %v1904_v58 }
  0x60   : > { %1182 = vmatpush.bf16.msra.mxu3 %v1896_v1  ;;  %1271 = vmatpush.bf16.msra.mxu0 %v1912_v10 }
  0x62   : > { %1111 = vmatpush.bf16.msrb.mxu2 %v1903_v63 }
  0x64   : > { %1183 = vmatpush.bf16.msra.mxu3 %v1895_v6  ;;  %1272 = vmatpush.bf16.msra.mxu0 %v1911_v12 }
  0x66   : > { %1112 = vmatpush.bf16.msrb.mxu2 %v1902_v3 }
  0x68   : > { %1184 = vmatpush.bf16.msra.mxu3 %v1894_v9  ;;  %1273 = vmatpush.bf16.msra.mxu0 %v1910_v18 }
  0x6b   : > { %731 = vmatmul.bf16.gmra.mxu3 %v586_v30  ;;  %947 = vmatmul.bf16.gmra.mxu0 %v818_v31 }
  0x6d   : > { %966 = vmatmul.bf16.gmra.mxu1 %v810_v32 }
  0x7d   : > { %971 = vmatmul.bf16.gmra.mxu1 %v826_v37 }
  0xa8   : > { %v2216_v38 = vpop.f32.mrf.mxu0 }
  0xaa   : > { %v2218_v39 = vpop.f32.mrf.mxu1 }
  0xab   : > { %v502_v19 = vadd.f32 %v2218_v39, %v2216_v38 }
  0xae   : > { %v2244_v51 = vpop.f32.mrf.mxu3 }
  0xb0   : > { %v2234_v46 = vpop.f32.mrf.mxu0  ;;  %v698_v7 = vpop.f32.mrf.mxu2 }
  0xb1   : > { %v699_v21 = vadd.f32 %v698_v7, %v502_v19 }
  0xb2   : > { %v2226_v43 = vpop.f32.mrf.mxu1 }
  0xb3   : > { %v504_v25 = vadd.f32 %v2226_v43, %v2234_v46 }
  0xb6   : > { %v2275_v0 = vpop.f32.mrf.mxu3 }
  0xb8   : > { %v482_v55 = vpop.f32.mrf.mxu0  ;;  %v700_v17 = vpop.f32.mrf.mxu2 }
  0xb9   : > { %v701_v28 = vadd.f32 %v700_v17, %v504_v25 }
  0xba   : > { %v2242_v50 = vpop.f32.mrf.mxu1 }
  0xbb   : > { %v507_v34 = vadd.f32 %v2242_v50, %v482_v55 }
  0xc0   : > { %v484_v4 = vpop.f32.mrf.mxu0  ;;  %v703_v27 = vpop.f32.mrf.mxu2 }
  0xc1   : > { %v704_v13 = vadd.f32 %v703_v27, %v507_v34 }
  0xc2   : > { %v2264_v60 = vpop.f32.mrf.mxu1 }
  0xc3   : > { %v509_v45 = vadd.f32 %v2264_v60, %v484_v4 }
  0xc8   : > { %v938_v11 = vpop.f32.mrf.mxu0  ;;  %v705_v37 = vpop.f32.mrf.mxu2 }
  0xc9   : > { %v706_v52 = vadd.f32 %v705_v37, %v509_v45 }
  0xca   : > { %v2286_v5 = vpop.f32.mrf.mxu1 }
  0xcb   : > { %v512_v59 = vadd.f32 %v2286_v5, %v2244_v51 }
  0xce   : > { %v722_v8 = vpop.f32.mrf.mxu3 }
  0xcf   : > { %v723_v23 = vadd.f32 %v722_v8, %v699_v21 }
  0xd0   : > { %v940_v22 = vpop.f32.mrf.mxu0  ;;  %v708_v56 = vpop.f32.mrf.mxu2 }
  0xd1   : > { %v709_v1 = vadd.f32 %v708_v56, %v512_v59 }
  0xd2   : > { %v2300_v16 = vpop.f32.mrf.mxu1 }
  0xd3   : > { %v514_v9 = vadd.f32 %v2300_v16, %v2275_v0 }
  0xd6   : > { %v724_v20 = vpop.f32.mrf.mxu3 }
  0xd7   : > { %v725_v31 = vadd.f32 %v724_v20, %v701_v28 }
  0xd8   : > { %v943_v33 = vpop.f32.mrf.mxu0  ;;  %v710_v8 = vpop.f32.mrf.mxu2 }
  0xd9   : > { %v711_v12 = vadd.f32 %v710_v8, %v514_v9 }
  0xda   : > { %v962_v15 = vpop.f32.mrf.mxu1 }
  0xdb   : > { %v963_v14 = vadd.f32 %v962_v15, %v938_v11 }
  0xdd   : > { %v977_v24 = vadd.f32 %v963_v14, %v723_v23 }
  0xde   : > { %v727_v29 = vpop.f32.mrf.mxu3 }
  0xdf   : > { %v983_v26 = vmax.f32 %v977_v24, 0.0  ;;  %v728_v39 = vadd.f32 %v727_v29, %v704_v13 }
  0xe0   : > { %v945_v44 = vpop.f32.mrf.mxu0 }
  0xe1   : > { %990 = vst [vmem:[#allocation2 + $0x8] sm:$0xff] %v983_v26 }
  0xe2   : > { %v964_v30 = vpop.f32.mrf.mxu1 }
  0xe3   : > { %v965_v32 = vadd.f32 %v964_v30, %v940_v22 }
  0xe5   : > { %v978_v48 = vadd.f32 %v965_v32, %v725_v31 }
  0xe6   : > { %v729_v42 = vpop.f32.mrf.mxu3 }
  0xe7   : > { %v984_v35 = vmax.f32 %v978_v48, 0.0  ;;  %v730_v54 = vadd.f32 %v729_v42, %v706_v52  ;;  %v1345_v42 = vld [vmem:[%s2376_s5 + $0x30] sm:$0xff] }
  0xe8   : > { %v997_v47 = vld [vmem:[#allocation2 + $0x7] sm:$0xff]  ;;  %v948_v62 = vpop.f32.mrf.mxu0  ;;  %v1341_v52 = vld [vmem:[%s2376_s5 + $0x10] sm:$0xff] }
  0xe9   : > { %991 = vst [vmem:[#allocation2 + $0x10] sm:$0xff] %v984_v35  ;;  %v1012_v36 = vpack.c.bf16 %v984_v35, %v983_v26 }
  0xea   : > { %v967_v38 = vpop.f32.mrf.mxu1 }
  0xeb   : > { %v968_v40 = vadd.f32 %v967_v38, %v943_v33  ;;  %1113 = vmatmul.bf16.vlgmr.msrb.gmra.mxu2 %v1012_v36 }
  0xed   : > { %v979_v43 = vadd.f32 %v968_v40, %v728_v39  ;;  %v1346_v40 = vld [vmem:[%s2376_s5 + $0x38] sm:$0xff] }
  0xee   : > { %v732_v58 = vpop.f32.mrf.mxu3  ;;  %1359 = vmatpush.msra.mxu2 %v1346_v40 }
  0xef   : > { %v985_v46 = vmax.f32 %v979_v43, 0.0  ;;  %v733_v6 = vadd.f32 %v732_v58, %v709_v1  ;;  %v1307_v1 = vld [vmem:[%s2374_s3 + $0x28] sm:$0xff] }
  0xf0   : > { %v998_v49 = vld [vmem:[#allocation2 + $0xf] sm:$0xff]  ;;  %v950_v18 = vpop.f32.mrf.mxu0  ;;  %1360 = vmatpush.msra.mxu2 %v1345_v42 }
  0xf1   : > { %992 = vst [vmem:[#allocation2 + $0x18] sm:$0xff] %v985_v46  ;;  %v1003_v50 = vpack.c.bf16 %v998_v49, %v997_v47  ;;  %v1015_v63 = vld [vmem:[#allocation2 + $0x9] sm:$0xff]  ;;  %v1342_v49 = vld [vmem:[%s2376_s5 + $0x18] sm:$0xff] }
  0xf2   : > { %v969_v53 = vpop.f32.mrf.mxu1 }
  0xf3   : > { %v970_v55 = vadd.f32 %v969_v53, %v945_v44  ;;  %1185 = vmatmul.bf16.vlgmr.msra.gmra.mxu3 %v1003_v50  ;;  %v1344_v44 = vld [vmem:[%s2376_s5 + $0x28] sm:$0xff] }
  0xf4   : > { %1361 = vmatpush.msra.mxu2 %v1344_v44  ;;  %v1340_v53 = vld [vmem:[%s2376_s5 + $0x8] sm:$0xff] }
  0xf5   : > { %v980_v57 = vadd.f32 %v970_v55, %v730_v54 }
  0xf6   : > { %v734_v51 = vpop.f32.mrf.mxu3 }
  0xf7   : > { %v986_v61 = vmax.f32 %v980_v57, 0.0  ;;  %v735_v20 = vadd.f32 %v734_v51, %v711_v12  ;;  %v1304_v12 = vld [vmem:[%s2374_s3 + $0x10] sm:$0xff] }
  0xf8   : > { %v1016_v60 = vld [vmem:[#allocation2 + $0x11] sm:$0xff] }
  0xf9   : > { %993 = vst [vmem:[#allocation2 + $0x20] sm:$0xff] %v986_v61  ;;  %v1021_v2 = vpack.c.bf16 %v1016_v60, %v1015_v63  ;;  %v1013_v3 = vpack.c.bf16 %v986_v61, %v985_v46  ;;  %v999_v5 = vld [vmem:[#allocation2 + $0x17] sm:$0xff]  ;;  %v1343_v46 = vld [vmem:[%s2376_s5 + $0x20] sm:$0xff] }
  0xfa   : > { %v972_v4 = vpop.f32.mrf.mxu1  ;;  %1362 = vmatpush.msra.mxu2 %v1343_v46 }
  0xfb   : > { %v973_v41 = vadd.f32 %v972_v4, %v948_v62  ;;  %1274 = vmatmul.bf16.vlgmr.msra.gmra.mxu0 %v1021_v2  ;;  %1118 = vmatmul.bf16.gmra.mxu2 %v1013_v3 }
  0xfc   : > { %1363 = vmatpush.msra.mxu2 %v1342_v49 }
  0xfd   : > { %v981_v7 = vadd.f32 %v973_v41, %v733_v6  ;;  %v1306_v41 = vld [vmem:[%s2374_s3 + $0x20] sm:$0xff] }
  0xfe   : > { %1364 = vmatpush.msra.mxu2 %v1341_v52 }
  0xff   : > { %v987_v10 = vmax.f32 %v981_v7, 0.0 }
 0x100   : > { %v1000_v11 = vld [vmem:[#allocation2 + $0x1f] sm:$0xff]  ;;  %1365 = vmatpush.msra.mxu2 %v1340_v53 }
 0x101   : > { %994 = vst [vmem:[#allocation2 + $0x28] sm:$0xff] %v987_v10  ;;  %v1004_v17 = vpack.c.bf16 %v1000_v11, %v999_v5  ;;  %v1017_v23 = vld [vmem:[#allocation2 + $0x19] sm:$0xff] }
 0x102   : > { %v974_v19 = vpop.f32.mrf.mxu1 }
 0x103   : > { %v975_v21 = vadd.f32 %v974_v19, %v950_v18  ;;  %1190 = vmatmul.bf16.gmra.mxu3 %v1004_v17  ;;  %v1303_v19 = vld [vmem:[%s2374_s3 + $0x8] sm:$0xff] }
 0x105   : > { %v982_v22 = vadd.f32 %v975_v21, %v735_v20 }
 0x107   : > { %v988_v15 = vmax.f32 %v982_v22, 0.0  ;;  %v1302_v22 = vld [vmem:[%s2374_s3] sm:$0xff] }
 0x108   : > { %v1018_v14 = vld [vmem:[#allocation2 + $0x21] sm:$0xff] }
 0x109   : > { %995 = vst [vmem:[#allocation2 + $0x30] sm:$0xff] %v988_v15  ;;  %v1022_v24 = vpack.c.bf16 %v1018_v14, %v1017_v23  ;;  %v1014_v25 = vpack.c.bf16 %v988_v15, %v987_v10  ;;  %v1001_v0 = vld [vmem:[#allocation2 + $0x27] sm:$0xff]  ;;  %v1305_v10 = vld [vmem:[%s2374_s3 + $0x18] sm:$0xff] }
 0x10a   : > { %v1314_v14 = vld [vmem:[%s2375_s4] sm:$0xff] }
 0x10b   : > { %1279 = vmatmul.bf16.gmra.mxu0 %v1022_v24  ;;  %1123 = vmatmul.bf16.gmra.mxu2 %v1014_v25  ;;  %v1339_v24 = vld [vmem:[%s2376_s5] sm:$0xff] }
 0x10c   : > { %1366 = vmatpush.msra.mxu2 %v1339_v24 }
 0x110   : > { %v1002_v16 = vld [vmem:[#allocation2 + $0x2f] sm:$0xff] }
 0x111   : > { %v1005_v26 = vpack.c.bf16 %v1002_v16, %v1001_v0  ;;  %v1019_v27 = vld [vmem:[#allocation2 + $0x29] sm:$0xff]  ;;  %v1020_v28 = vld [vmem:[#allocation2 + $0x31] sm:$0xff] }
 0x112   : > { %v1023_v29 = vpack.c.bf16 %v1020_v28, %v1019_v27 }
 0x113   : > { %1195 = vmatmul.bf16.gmra.mxu3 %v1005_v26 }
 0x11b   : > { %1284 = vmatmul.bf16.gmra.mxu0 %v1023_v29 }
 0x16e   : > { %v1114_v30 = vpop.f32.mrf.mxu2 }
 0x176   : > { %v1186_v31 = vpop.f32.mrf.mxu3  ;;  %v1116_v32 = vpop.f32.mrf.mxu2 }
 0x177   : > { %v1187_v2 = vadd.f32 %v1186_v31, %v1114_v30 }
 0x178   : > { %v1275_v33 = vpop.f32.mrf.mxu0 }
 0x179   : > { %v1290_v51 = vadd.f32 %v1275_v33, %v1187_v2 }
 0x17b   : > { %v1296_v20 = vmax.f32 %v1290_v51, 0.0 }
 0x17d   : > { %v1308_v23 = vmul.f32 %v1302_v22, %v1296_v20 }
 0x17e   : > { %v1188_v48 = vpop.f32.mrf.mxu3  ;;  %v1119_v35 = vpop.f32.mrf.mxu2 }
 0x17f   : > { %v1189_v62 = vadd.f32 %v1188_v48, %v1116_v32 }
 0x180   : > { %v1277_v34 = vpop.f32.mrf.mxu0 }
 0x181   : > { %v1291_v7 = vadd.f32 %v1277_v34, %v1189_v62 }
 0x183   : > { %v1297_v17 = vmax.f32 %v1291_v7, 0.0 }
 0x185   : > { %v1309_v15 = vmul.f32 %v1303_v19, %v1297_v17 }
 0x186   : > { %v1191_v13 = vpop.f32.mrf.mxu3  ;;  %v1121_v37 = vpop.f32.mrf.mxu2 }
 0x187   : > { %v1192_v57 = vadd.f32 %v1191_v13, %v1119_v35 }
 0x188   : > { %v1280_v36 = vpop.f32.mrf.mxu0 }
 0x189   : > { %v1292_v3 = vadd.f32 %v1280_v36, %v1192_v57 }
 0x18b   : > { %v1298_v5 = vmax.f32 %v1292_v3, 0.0 }
 0x18d   : > { %v1310_v21 = vmul.f32 %v1304_v12, %v1298_v5 }
 0x18e   : > { %v1193_v38 = vpop.f32.mrf.mxu3  ;;  %v1124_v43 = vpop.f32.mrf.mxu2 }
 0x18f   : > { %v1194_v54 = vadd.f32 %v1193_v38, %v1121_v37 }
 0x190   : > { %v1282_v39 = vpop.f32.mrf.mxu0 }
 0x191   : > { %v1293_v63 = vadd.f32 %v1282_v39, %v1194_v54 }
 0x193   : > { %v1299_v8 = vmax.f32 %v1293_v63, 0.0 }
 0x195   : > { %v1311_v18 = vmul.f32 %v1305_v10, %v1299_v8 }
 0x196   : > { %v1196_v45 = vpop.f32.mrf.mxu3  ;;  %v1126_v55 = vpop.f32.mrf.mxu2 }
 0x197   : > { %v1197_v50 = vadd.f32 %v1196_v45, %v1124_v43 }
 0x198   : > { %v1285_v47 = vpop.f32.mrf.mxu0 }
 0x199   : > { %v1294_v58 = vadd.f32 %v1285_v47, %v1197_v50 }
 0x19b   : > { %v1300_v4 = vmax.f32 %v1294_v58, 0.0 }
 0x19d   : > { %v1312_v11 = vmul.f32 %v1306_v41, %v1300_v4 }
 0x19e   : > { %v1198_v56 = vpop.f32.mrf.mxu3 }
 0x19f   : > { %v1199_v59 = vadd.f32 %v1198_v56, %v1126_v55 }
 0x1a0   : > { %v1287_v61 = vpop.f32.mrf.mxu0 }
 0x1a1   : > { %v1295_v60 = vadd.f32 %v1287_v61, %v1199_v59 }
 0x1a3   : > { %v1301_v6 = vmax.f32 %v1295_v60, 0.0 }
 0x1a5   : > { %v1313_v9 = vmul.f32 %v1307_v1, %v1301_v6 }
 0x1a7   : > { %1329 = vmatpush.msra.mxu1 %v1313_v9 }
 0x1a9   : > { %1330 = vmatpush.msra.mxu1 %v1312_v11 }
 0x1ab   : > { %1331 = vmatpush.msra.mxu1 %v1311_v18 }
 0x1ad   : > { %1332 = vmatpush.msra.mxu1 %v1310_v21 }
 0x1af   : > { %1333 = vmatpush.msra.mxu1 %v1309_v15 }
 0x1b1   : > { %1334 = vmatpush.msra.mxu1 %v1308_v23 }
 0x1b2   : > { %1841 = vmatmul.msk.f32.vlgmr.msra.gmra.mxu1 %vm1315_vm2, %v1314_v14 }
 0x22f   : > { %v1336_v25 = vpop.f32.mrf.mxu1 }
 0x230   : > { %1842 = vmatmul.msk.f32.vlgmr.msra.gmra.mxu2 %vm1347_vm3, %v1336_v25 }
 0x2b3   : > { %v1368_v0 = vpop.f32.mrf.mxu2 }
 0x2b4   : > { %v1371_v16 = vand.u32 2147483647, %v1368_v0  ;;  %vm1375_vm8 = vcmp.ge.f32.partialorder %v1368_v0, 0.0 }
 0x2b6   : > { %v1372_v26 = vsub.f32 0.0, %v1371_v16 }
 0x2b8   : > { %v1373_v27 = vmul.f32 1.442695, %v1372_v26 }
 0x2ba   : > { %1935 = vpow2.f32 %v1373_v27 }
 0x2c0   : > { %v1936_v28 = vpop.eup %1935 }
 0x2c1   : > { %v1376_v29 = vadd.f32 1.0, %v1936_v28 }
 0x2c3   : > { %1937 = vrcp.f32 %v1376_v29  ;;  %v1388_v33 = vand.u32 2147483648, %v1376_v29  ;;  %v1386_v34 = vand.u32 2147483647, %v1376_v29  ;;  %vm1382_vm5 = vweird.f32 %v1376_v29 }
 0x2c5   : > { %v1389_v13 = vor.u32 1.1754944e-38, %v1388_v33  ;;  %vm1387_vm7 = vcmp.eq.f32.partialorder %v1386_v34, 8.507059e+37 }
 0x2c9   : > { %v1938_v30 = vpop.eup %1937 }
 0x2ca   : > { %v1378_v31 = vmul.f32 %v1938_v30, %v1376_v29  ;;  %vm1383_vm4 = vweird.f32 %v1938_v30 }
 0x2cb   : > { %vm1384_vm6 = vmor %vm1382_vm5, %vm1383_vm4 }
 0x2cc   : > { %v1379_v32 = vsub.f32 1.0, %v1378_v31 }
 0x2ce   : > { %v1380_v48 = vmul.f32 %v1938_v30, %v1379_v32 }
 0x2d0   : > { %v1381_v35 = vadd.f32 %v1938_v30, %v1380_v48 }
 0x2d2   : > { %v1385_v36 = vsel %vm1384_vm6, %v1938_v30, %v1381_v35 }
 0x2d3   : > { %v1390_v37 = vsel %vm1387_vm7, %v1389_v13, %v1385_v36 }
 0x2d4   : > { %v1392_v38 = vmul.f32 %v1936_v28, %v1390_v37 }
 0x2d6   : > { %v1393_v39 = vsel %vm1375_vm8, %v1390_v37, %v1392_v38 }
 0x2d7   : > { %1394 = vst [vmem:[%s254_s8] sm:$0xff] %v1393_v39 }
 0x2d8 PF: > { %s16_s21 = sadd.s32 1, %s1945_s21  }
 0x2d9   : > { %p13_p5 = scmp.ge.s32.totalorder %s16_s21, 4  }
 0x2db   :  { %15 = sbr.rel (!%p13_p5) target bundleno = 1 (0x1), region = 78 }

</bundles_post_ra>
